<compile_context>
chip_gen: v7x
topology: tpu7x:2x2x1
jax: 0.10.0
libtpu: 0.0.40
codegen_flags: <defaults>
</compile_context>

<pallas_src>
import functools

import jax
import jax.numpy as jnp
from jax import lax
from jax.experimental import pallas as pl
from jax.experimental.pallas import tpu as pltpu

VMEM_SPEC = pl.BlockSpec(memory_space=pltpu.MemorySpace.VMEM)


def _pick_tile(n):
    # dst-row tile: keep the lane-dense (1, tile) output blocks 128-aligned;
    # fall back to whole-array blocks (== full dims) for small / irregular N.
    for t in (512, 256, 128):
        if n % t == 0:
            return t
    return n


def _vmem_limit(est_bytes):
    # Default scoped VMEM limit (16/32 MiB) is hit long before physical VMEM; size
    # the limit from the actual buffers with 2x headroom, capped to fit v7x (64 MiB).
    return int(min(64 * 1024 * 1024, max(4 * 1024 * 1024, 2 * est_bytes)))


# ---------------- stage 1: FeatureBooster ----------------
def booster_kernel(x_ref, w1_ref, w2_ref, x1_ref):
    x = x_ref[...]
    # scatter over batch=arange(N) is bijective -> max_result == sum_result == x,
    # so y = sigmoid(mlp(x) + mlp(x)) = sigmoid(2 * mlp(x))
    h = jnp.maximum(jnp.dot(x, w1_ref[...], preferred_element_type=jnp.float32), 0.0)
    m = jnp.dot(h, w2_ref[...], preferred_element_type=jnp.float32)
    x1_ref[...] = x * jax.nn.sigmoid(2.0 * m)


# ---------------- stage 2: SAGE(mean)+ReLU + GAT linear (per dst-row tile) ----------
def sage_gatlin_kernel(adj_ref, invdeg_ref, x1_ref, sage_ref, gat_ref,
                       g_ref, asrc_ref, *, tile, dim_in, dim_hidden):
    i = pl.program_id(0)
    row0 = pl.multiple_of(i * tile, 8)
    F, H = dim_in, dim_hidden

    # mean aggregation: bf16 0/1 adjacency x bf16 x1 on the MXU (f32 acc),
    # then the per-dst 1/deg is a cheap (tile,1) VPU column scale.
    x1_all = x1_ref[...]                                                     # (N, F) f32
    agg = invdeg_ref[...] * jnp.dot(adj_ref[...], x1_all.astype(jnp.bfloat16),
                                    preferred_element_type=jnp.float32)      # (tile, F)

    x1_t = x1_ref[pl.ds(row0, tile), :]                                      # (tile, F)
    wl = sage_ref[0:F, :]                                                    # lin_l weight
    wr = sage_ref[F:2 * F, :]                                                # lin_r weight
    bl = sage_ref[2 * F:2 * F + 1, :]                                        # lin_l bias
    h1 = jnp.maximum(
        jnp.dot(agg, wl, preferred_element_type=jnp.float32) + bl
        + jnp.dot(x1_t, wr, preferred_element_type=jnp.float32), 0.0)        # (tile, H)

    # GAT linear part; also emit this tile's chunk of the (1, N) source-attention
    # row so stage 3 never recomputes or transposes it.
    g = jnp.dot(h1, gat_ref[0:H, :], preferred_element_type=jnp.float32)     # (tile, d2)
    g_ref[...] = g
    asrc_ref[...] = lax.dot_general(gat_ref[H:H + 1, :], g, (((1,), (1,)), ((), ())),
                                    preferred_element_type=jnp.float32)      # (1, tile)


# ---------------- stage 3: GAT softmax/agg + ReLU + Cheb(K=1) + sigmoid -------------
def gat_cheb_kernel(adj_ref, g_ref, asrc_ref, att_ref, o_ref, *, tile, num_nodes):
    i = pl.program_id(0)
    row0 = pl.multiple_of(i * tile, 8)

    g_all = g_ref[...]                                                       # (N, d2) f32
    g_t = g_ref[pl.ds(row0, tile), :]                                        # (tile, d2)

    a_dst = jnp.sum(g_t * att_ref[0:1, :], axis=-1, keepdims=True)           # (tile, 1)
    s = a_dst + asrc_ref[...]                                                # (tile, N)
    s = jnp.where(s > 0.0, s, 0.2 * s)                                       # LeakyReLU(0.2)

    # GAT mask derived in-kernel: existing edge OR self-loop (no adj_gat input).
    col = lax.broadcasted_iota(jnp.int32, (tile, num_nodes), 1)
    row = lax.broadcasted_iota(jnp.int32, (tile, num_nodes), 0) + row0
    mask = (adj_ref[...] > 0) | (col == row)
    s = jnp.where(mask, s, -1e30)                                            # s stays f32

    m = jnp.max(s, axis=-1, keepdims=True)
    e = jnp.exp(s - m)                                  # masked entries underflow to 0
    p = e * pl.reciprocal(jnp.sum(e, axis=-1, keepdims=True), approx=True)   # EUP slot

    h2 = jnp.maximum(
        jnp.dot(p.astype(jnp.bfloat16), g_all.astype(jnp.bfloat16),
                preferred_element_type=jnp.float32) + att_ref[1:2, :], 0.0)  # (tile, d2)

    # ChebConv(K=1) == Linear(d2 -> 1); emit logits as a lane-dense (1, tile) row.
    logit = lax.dot_general(att_ref[2:3, :], h2, (((1,), (1,)), ((), ())),
                            preferred_element_type=jnp.float32) + att_ref[3:4, 0:1]
    o_ref[...] = jax.nn.sigmoid(logit)


# ---------------- parameter init (deterministic, synthetic) ----------------
def init_params(key, dim_in, dim_hidden, slices):
    d_mid = dim_in // slices
    d2 = dim_hidden // 2
    ks = jax.random.split(key, 11)
    s = 0.1
    n = lambda k, shape: (jax.random.normal(k, shape, jnp.float32) * s)
    return {
        "fb_w1":    n(ks[0], (dim_in, d_mid)),       # FeatureBooster mlp[0] (no bias)
        "fb_w2":    n(ks[1], (d_mid, dim_in)),       # FeatureBooster mlp[2] (no bias)
        "sage_wl":  n(ks[2], (dim_in, dim_hidden)),  # SAGE lin_l weight (neighbors)
        "sage_bl":  n(ks[3], (1, dim_hidden)),       # SAGE lin_l bias
        "sage_wr":  n(ks[4], (dim_in, dim_hidden)),  # SAGE lin_r weight (root, no bias)
        "gat_w":    n(ks[5], (dim_hidden, d2)),      # GAT lin weight (no bias)
        "gat_asrc": n(ks[6], (1, d2)),               # GAT att_src (row)
        "gat_adst": n(ks[7], (1, d2)),               # GAT att_dst (row)
        "gat_b":    n(ks[8], (1, d2)),               # GAT bias
        "cheb_w":   n(ks[9], (1, d2)),               # ChebConv lins[0] weight (row)
        "cheb_b":   n(ks[10], (1, 1)),               # ChebConv bias
    }


# ---------------- glue: dense graph structure ----------------
def _graph_mats(edge_index, num_nodes):
    src, dst = edge_index[0], edge_index[1]
    adj = jnp.zeros((num_nodes, num_nodes), jnp.float32).at[dst, src].set(1.0)
    deg = jnp.sum(adj, axis=1, keepdims=True)
    invdeg = 1.0 / jnp.maximum(deg, 1.0)           # PyG mean aggr: 0 for isolated nodes
    return adj.astype(jnp.bfloat16), invdeg        # 0/1 adjacency is exact in bf16


def net_forward(params, x, edge_index, num_nodes):
    N = num_nodes
    F_dim, H = params["sage_wl"].shape
    d2 = params["gat_w"].shape[1]
    adj01, invdeg = _graph_mats(edge_index, N)
    tile = _pick_tile(N)
    grid = (N // tile,)

    # pack the small parameter tensors (fewer DMA descriptors / (8,128) pads)
    sage_pack = jnp.concatenate(
        [params["sage_wl"], params["sage_wr"], params["sage_bl"]], axis=0)   # (2F+1, H)
    gat_pack = jnp.concatenate([params["gat_w"], params["gat_asrc"]], axis=0)  # (H+1, d2)
    att_pack = jnp.concatenate(
        [params["gat_adst"], params["gat_b"], params["cheb_w"],
         jnp.broadcast_to(params["cheb_b"], (1, d2))], axis=0)               # (4, d2)

    # ---- stage 1: FeatureBooster (whole-array; only N*F elements) ----
    x1 = pl.pallas_call(
        booster_kernel,
        out_shape=jax.ShapeDtypeStruct((N, F_dim), jnp.float32),
        in_specs=[VMEM_SPEC, VMEM_SPEC, VMEM_SPEC],
        out_specs=VMEM_SPEC,
        compiler_params=pltpu.CompilerParams(
            vmem_limit_bytes=_vmem_limit(4 * N * F_dim * 4)),
    )(x, params["fb_w1"], params["fb_w2"])

    # ---- stage 2: SAGE(mean)+ReLU + GAT linear, tiled over dst rows ----
    est_b = (2 * tile * N * 2 + 2 * tile * 128 * 4 + 2 * N * F_dim * 4
             + 2 * sage_pack.size * 4 + 2 * gat_pack.size * 4
             + 2 * tile * max(d2, 128) * 4 + 2 * 8 * max(tile, 128) * 4)
    g, a_src = pl.pallas_call(
        functools.partial(sage_gatlin_kernel, tile=tile, dim_in=F_dim, dim_hidden=H),
        out_shape=(jax.ShapeDtypeStruct((N, d2), jnp.float32),
                   jax.ShapeDtypeStruct((1, N), jnp.float32)),
        grid=grid,
        in_specs=[pl.BlockSpec((tile, N), lambda i: (i, 0)),          # adj tile (bf16, streamed)
                  pl.BlockSpec((tile, 1), lambda i: (i, 0)),          # 1/deg tile
                  pl.BlockSpec((N, F_dim), lambda i: (0, 0)),         # x1, VMEM-resident
                  pl.BlockSpec((2 * F_dim + 1, H), lambda i: (0, 0)),
                  pl.BlockSpec((H + 1, d2), lambda i: (0, 0))],
        out_specs=(pl.BlockSpec((tile, d2), lambda i: (i, 0)),
                   pl.BlockSpec((1, tile), lambda i: (0, i))),        # lane-dense chunk
        compiler_params=pltpu.CompilerParams(
            dimension_semantics=("parallel",),                        # v7x: 2 TCs share dst tiles
            vmem_limit_bytes=_vmem_limit(est_b)),
    )(adj01, invdeg, x1, sage_pack, gat_pack)

    # ---- stage 3: GAT softmax/aggregate + ReLU + ChebConv(K=1) + sigmoid, tiled ----
    est_c = (2 * tile * N * 2 + 2 * N * max(d2, 128) * 4 + 2 * 8 * N * 4
             + 2 * att_pack.size * 4 + 2 * 8 * max(tile, 128) * 4 + tile * N * 8)
    out_row = pl.pallas_call(
        functools.partial(gat_cheb_kernel, tile=tile, num_nodes=N),
        out_shape=jax.ShapeDtypeStruct((1, N), jnp.float32),
        grid=grid,
        in_specs=[pl.BlockSpec((tile, N), lambda i: (i, 0)),          # adj tile (streamed again)
                  pl.BlockSpec((N, d2), lambda i: (0, 0)),            # g, VMEM-resident
                  pl.BlockSpec((1, N), lambda i: (0, 0)),             # a_src row, resident
                  pl.BlockSpec((4, d2), lambda i: (0, 0))],           # packed attention params
        out_specs=pl.BlockSpec((1, tile), lambda i: (0, i)),          # lane-dense output
        compiler_params=pltpu.CompilerParams(
            dimension_semantics=("parallel",),
            vmem_limit_bytes=_vmem_limit(est_c)),
    )(adj01, g, a_src, att_pack)

    return out_row.reshape(num_nodes, 1)


# ---------------- pure-JAX f32 reference (PyTorch / PyG semantics) ----------------
def net_forward_ref(params, x, edge_index, num_nodes):
    src, dst = edge_index[0], edge_index[1]
    adj = jnp.zeros((num_nodes, num_nodes), jnp.float32).at[dst, src].set(1.0)
    deg = jnp.sum(adj, axis=1, keepdims=True)
    invdeg = 1.0 / jnp.maximum(deg, 1.0)
    adj_sl = jnp.clip(adj + jnp.eye(num_nodes, dtype=jnp.float32), 0.0, 1.0)
    # FeatureBooster
    m = jnp.maximum(x @ params["fb_w1"], 0.0) @ params["fb_w2"]
    x1 = x * jax.nn.sigmoid(2.0 * m)
    # SAGE(mean) + ReLU
    agg = invdeg * (adj @ x1)
    h1 = jnp.maximum(agg @ params["sage_wl"] + params["sage_bl"]
                     + x1 @ params["sage_wr"], 0.0)
    # GAT (1 head) + ReLU
    g = h1 @ params["gat_w"]
    a_dst = jnp.sum(g * params["gat_adst"], axis=-1, keepdims=True)      # (N,1)
    a_src = jnp.sum(g * params["gat_asrc"], axis=-1, keepdims=True).T    # (1,N)
    s = a_dst + a_src
    s = jnp.where(s > 0.0, s, 0.2 * s)
    s = jnp.where(adj_sl > 0.0, s, -jnp.inf)
    e = jnp.exp(s - jnp.max(s, axis=-1, keepdims=True))
    p = e / jnp.sum(e, axis=-1, keepdims=True)
    h2 = jnp.maximum(p @ g + params["gat_b"], 0.0)
    # Cheb K=1 + sigmoid
    return jax.nn.sigmoid(jnp.sum(h2 * params["cheb_w"], axis=-1, keepdims=True)
                          + params["cheb_b"])


if __name__ == "__main__":
    # Small shapes consistent with the module (dim_in, dim_hidden scaled down).
    N, DIM_IN, DIM_HIDDEN, SLICES = 16, 32, 16, 2

    key = jax.random.PRNGKey(0)
    kx, kp = jax.random.split(key)
    x = jax.random.normal(kx, (N, DIM_IN), jnp.float32)

    # Deterministic bidirectional ring graph (unique edges, no self-loops).
    i = jnp.arange(N, dtype=jnp.int32)
    j = (i + 1) % N
    edge_index = jnp.stack([jnp.concatenate([i, j]), jnp.concatenate([j, i])])  # (2, 2N)

    params = init_params(kp, DIM_IN, DIM_HIDDEN, SLICES)

    fwd = jax.jit(lambda p, xx, ei: net_forward(p, xx, ei, N))
    out = jax.block_until_ready(fwd(params, x, edge_index))

    ref = net_forward_ref(params, x, edge_index, N)
    assert out.shape == (N, 1)
    assert bool(jnp.all(jnp.isfinite(out)))
    # Kernel deliberately uses bf16 MXU for the two N^2 matmuls and an approximate
    # reciprocal in the softmax -> ~1e-3-level deviation vs the pure-f32 reference.
    assert jnp.allclose(out, ref, atol=2e-3, rtol=2e-2), "mismatch vs pure-JAX reference"

    print("KERNEL_OK")
</pallas_src>

<mosaic_0001>
module attributes {stable_mosaic.version = 11 : i64} {
  func.func @booster_kernel(%arg0: memref<16x32xf32, #tpu.memory_space<vmem>>, %arg1: memref<32x16xf32, #tpu.memory_space<vmem>>, %arg2: memref<16x32xf32, #tpu.memory_space<vmem>>, %arg3: memref<16x32xf32, #tpu.memory_space<vmem>>) attributes {dimension_semantics = [], scalar_prefetch = 0 : i64, scratch_operands = 0 : i64, tpu.core_type = #tpu.core_type<tc>} {
    %c0 = arith.constant 0 : index
    %c0_0 = arith.constant 0 : index
    %0 = vector.load %arg0[%c0, %c0_0] : memref<16x32xf32, #tpu.memory_space<vmem>>, vector<16x32xf32>
    %c0_1 = arith.constant 0 : index
    %c0_2 = arith.constant 0 : index
    %1 = vector.load %arg1[%c0_1, %c0_2] : memref<32x16xf32, #tpu.memory_space<vmem>>, vector<32x16xf32>
    %cst = arith.constant dense<0.000000e+00> : vector<16x16xf32>
    %2 = tpu.matmul %0, %1, %cst {dimension_numbers = #tpu.dot_dimension_numbers<[1], [0], [0], [1], [0, 0, 1, 1], [], []>} : vector<16x32xf32>, vector<32x16xf32>, vector<16x16xf32> -> vector<16x16xf32>
    %cst_3 = arith.constant 0.000000e+00 : f32
    %3 = vector.broadcast %cst_3 : f32 to vector<16x16xf32>
    %4 = arith.maximumf %2, %3 : vector<16x16xf32>
    %c0_4 = arith.constant 0 : index
    %c0_5 = arith.constant 0 : index
    %5 = vector.load %arg2[%c0_4, %c0_5] : memref<16x32xf32, #tpu.memory_space<vmem>>, vector<16x32xf32>
    %cst_6 = arith.constant dense<0.000000e+00> : vector<16x32xf32>
    %6 = tpu.matmul %4, %5, %cst_6 {dimension_numbers = #tpu.dot_dimension_numbers<[1], [0], [0], [1], [0, 0, 1, 1], [], []>} : vector<16x16xf32>, vector<16x32xf32>, vector<16x32xf32> -> vector<16x32xf32>
    %cst_7 = arith.constant 2.000000e+00 : f32
    %7 = vector.broadcast %cst_7 : f32 to vector<16x32xf32>
    %8 = arith.mulf %7, %6 : vector<16x32xf32>
    %9 = arith.negf %8 : vector<16x32xf32>
    %10 = math.exp %9 : vector<16x32xf32>
    %cst_8 = arith.constant 1.000000e+00 : f32
    %11 = vector.broadcast %cst_8 : f32 to vector<16x32xf32>
    %12 = arith.addf %11, %10 : vector<16x32xf32>
    %13 = arith.divf %11, %12 : vector<16x32xf32>
    %14 = arith.mulf %0, %13 : vector<16x32xf32>
    %c0_9 = arith.constant 0 : index
    %c0_10 = arith.constant 0 : index
    %15 = vector.load %arg3[%c0_9, %c0_10] : memref<16x32xf32, #tpu.memory_space<vmem>>, vector<16x32xf32>
    tpu.vector_store %arg3[%c0_9, %c0_10], %14 {strides = array<i32>} : memref<16x32xf32, #tpu.memory_space<vmem>>, vector<16x32xf32>,
    return
  }
}

module attributes {stable_mosaic.version = 11 : i64} {
  func.func @sage_gatlin_kernel(%arg0: i32, %arg1: memref<16x16xbf16, #tpu.memory_space<vmem>>, %arg2: memref<16x1xf32, #tpu.memory_space<vmem>>, %arg3: memref<16x32xf32, #tpu.memory_space<vmem>>, %arg4: memref<65x16xf32, #tpu.memory_space<vmem>>, %arg5: memref<17x8xf32, #tpu.memory_space<vmem>>, %arg6: memref<16x8xf32, #tpu.memory_space<vmem>>, %arg7: memref<1x16xf32, #tpu.memory_space<vmem>>) attributes {dimension_semantics = [#tpu.dimension_semantics<parallel>], iteration_bounds = array<i64: 1>, scalar_prefetch = 0 : i64, scratch_operands = 0 : i64, tpu.core_type = #tpu.core_type<tc>, window_params = [{transform_indices = @transform_0, window_bounds = array<i64: 16, 16>}, {transform_indices = @transform_1, window_bounds = array<i64: 16, 1>}, {pipeline_mode = #tpu.pipeline_mode<synchronous>, transform_indices = @transform_2, window_bounds = array<i64: 16, 32>}, {pipeline_mode = #tpu.pipeline_mode<synchronous>, transform_indices = @transform_3, window_bounds = array<i64: 65, 16>}, {pipeline_mode = #tpu.pipeline_mode<synchronous>, transform_indices = @transform_4, window_bounds = array<i64: 17, 8>}, {transform_indices = @transform_5, window_bounds = array<i64: 16, 8>}, {transform_indices = @transform_6, window_bounds = array<i64: 1, 16>}]} {
    %c16_i32 = arith.constant 16 : i32
    %0 = arith.muli %arg0, %c16_i32 : i32
    %1 = tpu.assume_multiple %0, 8 : i32
    %c0 = arith.constant 0 : index
    %c0_0 = arith.constant 0 : index
    %2 = vector.load %arg3[%c0, %c0_0] : memref<16x32xf32, #tpu.memory_space<vmem>>, vector<16x32xf32>
    %c0_1 = arith.constant 0 : index
    %c0_2 = arith.constant 0 : index
    %3 = vector.load %arg2[%c0_1, %c0_2] : memref<16x1xf32, #tpu.memory_space<vmem>>, vector<16x1xf32>
    %c0_3 = arith.constant 0 : index
    %c0_4 = arith.constant 0 : index
    %4 = vector.load %arg1[%c0_3, %c0_4] : memref<16x16xbf16, #tpu.memory_space<vmem>>, vector<16x16xbf16>
    %5 = arith.truncf %2 : vector<16x32xf32> to vector<16x32xbf16>
    %cst = arith.constant dense<0.000000e+00> : vector<16x32xf32>
    %6 = tpu.matmul %4, %5, %cst {dimension_numbers = #tpu.dot_dimension_numbers<[1], [0], [0], [1], [0, 0, 1, 1], [], []>} : vector<16x16xbf16>, vector<16x32xbf16>, vector<16x32xf32> -> vector<16x32xf32>
    %7 = vector.broadcast %3 : vector<16x1xf32> to vector<16x32xf32>
    %8 = arith.mulf %7, %6 : vector<16x32xf32>
    %9 = arith.index_cast %1 : i32 to index
    %c0_5 = arith.constant 0 : index
    %10 = vector.load %arg3[%9, %c0_5] : memref<16x32xf32, #tpu.memory_space<vmem>>, vector<16x32xf32>
    %c0_6 = arith.constant 0 : index
    %c0_7 = arith.constant 0 : index
    %11 = vector.load %arg4[%c0_6, %c0_7] : memref<65x16xf32, #tpu.memory_space<vmem>>, vector<32x16xf32>
    %c32 = arith.constant 32 : index
    %c0_8 = arith.constant 0 : index
    %12 = vector.load %arg4[%c32, %c0_8] : memref<65x16xf32, #tpu.memory_space<vmem>>, vector<32x16xf32>
    %c64 = arith.constant 64 : index
    %c0_9 = arith.constant 0 : index
    %13 = vector.load %arg4[%c64, %c0_9] : memref<65x16xf32, #tpu.memory_space<vmem>>, vector<1x16xf32>
    %cst_10 = arith.constant dense<0.000000e+00> : vector<16x16xf32>
    %14 = tpu.matmul %8, %11, %cst_10 {dimension_numbers = #tpu.dot_dimension_numbers<[1], [0], [0], [1], [0, 0, 1, 1], [], []>} : vector<16x32xf32>, vector<32x16xf32>, vector<16x16xf32> -> vector<16x16xf32>
    %15 = vector.broadcast %13 : vector<1x16xf32> to vector<16x16xf32>
    %16 = arith.addf %14, %15 : vector<16x16xf32>
    %cst_11 = arith.constant dense<0.000000e+00> : vector<16x16xf32>
    %17 = tpu.matmul %10, %12, %cst_11 {dimension_numbers = #tpu.dot_dimension_numbers<[1], [0], [0], [1], [0, 0, 1, 1], [], []>} : vector<16x32xf32>, vector<32x16xf32>, vector<16x16xf32> -> vector<16x16xf32>
    %18 = arith.addf %16, %17 : vector<16x16xf32>
    %cst_12 = arith.constant 0.000000e+00 : f32
    %19 = vector.broadcast %cst_12 : f32 to vector<16x16xf32>
    %20 = arith.maximumf %18, %19 : vector<16x16xf32>
    %c0_13 = arith.constant 0 : index
    %c0_14 = arith.constant 0 : index
    %21 = vector.load %arg5[%c0_13, %c0_14] : memref<17x8xf32, #tpu.memory_space<vmem>>, vector<16x8xf32>
    %cst_15 = arith.constant dense<0.000000e+00> : vector<16x8xf32>
    %22 = tpu.matmul %20, %21, %cst_15 {dimension_numbers = #tpu.dot_dimension_numbers<[1], [0], [0], [1], [0, 0, 1, 1], [], []>} : vector<16x16xf32>, vector<16x8xf32>, vector<16x8xf32> -> vector<16x8xf32>
    %c0_16 = arith.constant 0 : index
    %c0_17 = arith.constant 0 : index
    %23 = vector.load %arg6[%c0_16, %c0_17] : memref<16x8xf32, #tpu.memory_space<vmem>>, vector<16x8xf32>
    tpu.vector_store %arg6[%c0_16, %c0_17], %22 {strides = array<i32>} : memref<16x8xf32, #tpu.memory_space<vmem>>, vector<16x8xf32>,
    %c16 = arith.constant 16 : index
    %c0_18 = arith.constant 0 : index
    %24 = vector.load %arg5[%c16, %c0_18] : memref<17x8xf32, #tpu.memory_space<vmem>>, vector<1x8xf32>
    %cst_19 = arith.constant dense<0.000000e+00> : vector<1x16xf32>
    %25 = tpu.matmul %24, %22, %cst_19 {dimension_numbers = #tpu.dot_dimension_numbers<[1], [1], [0], [0], [0, 0, 1, 0], [], []>} : vector<1x8xf32>, vector<16x8xf32>, vector<1x16xf32> -> vector<1x16xf32>
    %c0_20 = arith.constant 0 : index
    %c0_21 = arith.constant 0 : index
    %26 = vector.load %arg7[%c0_20, %c0_21] : memref<1x16xf32, #tpu.memory_space<vmem>>, vector<1x16xf32>
    tpu.vector_store %arg7[%c0_20, %c0_21], %25 {strides = array<i32>} : memref<1x16xf32, #tpu.memory_space<vmem>>, vector<1x16xf32>,
    return
  }
  func.func @transform_0(%arg0: i32) -> (i32, i32) {
    %c0_i32 = arith.constant 0 : i32
    %c0_i32_0 = arith.constant 0 : i32
    return %arg0, %c0_i32 : i32, i32
  }
  func.func @transform_1(%arg0: i32) -> (i32, i32) {
    %c0_i32 = arith.constant 0 : i32
    %c0_i32_0 = arith.constant 0 : i32
    return %arg0, %c0_i32 : i32, i32
  }
  func.func @transform_2(%arg0: i32) -> (i32, i32) {
    %c0_i32 = arith.constant 0 : i32
    %c0_i32_0 = arith.constant 0 : i32
    %c0_i32_1 = arith.constant 0 : i32
    return %c0_i32, %c0_i32_0 : i32, i32
  }
  func.func @transform_3(%arg0: i32) -> (i32, i32) {
    %c0_i32 = arith.constant 0 : i32
    %c0_i32_0 = arith.constant 0 : i32
    %c0_i32_1 = arith.constant 0 : i32
    return %c0_i32, %c0_i32_0 : i32, i32
  }
  func.func @transform_4(%arg0: i32) -> (i32, i32) {
    %c0_i32 = arith.constant 0 : i32
    %c0_i32_0 = arith.constant 0 : i32
    %c0_i32_1 = arith.constant 0 : i32
    return %c0_i32, %c0_i32_0 : i32, i32
  }
  func.func @transform_5(%arg0: i32) -> (i32, i32) {
    %c0_i32 = arith.constant 0 : i32
    %c0_i32_0 = arith.constant 0 : i32
    return %arg0, %c0_i32 : i32, i32
  }
  func.func @transform_6(%arg0: i32) -> (i32, i32) {
    %c0_i32 = arith.constant 0 : i32
    %c0_i32_0 = arith.constant 0 : i32
    return %c0_i32, %arg0 : i32, i32
  }
}

module attributes {stable_mosaic.version = 11 : i64} {
  func.func @gat_cheb_kernel(%arg0: i32, %arg1: memref<16x16xbf16, #tpu.memory_space<vmem>>, %arg2: memref<16x8xf32, #tpu.memory_space<vmem>>, %arg3: memref<1x16xf32, #tpu.memory_space<vmem>>, %arg4: memref<4x8xf32, #tpu.memory_space<vmem>>, %arg5: memref<1x16xf32, #tpu.memory_space<vmem>>) attributes {dimension_semantics = [#tpu.dimension_semantics<parallel>], iteration_bounds = array<i64: 1>, scalar_prefetch = 0 : i64, scratch_operands = 0 : i64, tpu.core_type = #tpu.core_type<tc>, window_params = [{transform_indices = @transform_0, window_bounds = array<i64: 16, 16>}, {pipeline_mode = #tpu.pipeline_mode<synchronous>, transform_indices = @transform_1, window_bounds = array<i64: 16, 8>}, {pipeline_mode = #tpu.pipeline_mode<synchronous>, transform_indices = @transform_2, window_bounds = array<i64: 1, 16>}, {pipeline_mode = #tpu.pipeline_mode<synchronous>, transform_indices = @transform_3, window_bounds = array<i64: 4, 8>}, {transform_indices = @transform_4, window_bounds = array<i64: 1, 16>}]} {
    %c16_i32 = arith.constant 16 : i32
    %0 = arith.muli %arg0, %c16_i32 : i32
    %1 = tpu.assume_multiple %0, 8 : i32
    %c0 = arith.constant 0 : index
    %c0_0 = arith.constant 0 : index
    %2 = vector.load %arg2[%c0, %c0_0] : memref<16x8xf32, #tpu.memory_space<vmem>>, vector<16x8xf32>
    %3 = arith.index_cast %1 : i32 to index
    %c0_1 = arith.constant 0 : index
    %4 = vector.load %arg2[%3, %c0_1] : memref<16x8xf32, #tpu.memory_space<vmem>>, vector<16x8xf32>
    %c0_2 = arith.constant 0 : index
    %c0_3 = arith.constant 0 : index
    %5 = vector.load %arg4[%c0_2, %c0_3] : memref<4x8xf32, #tpu.memory_space<vmem>>, vector<1x8xf32>
    %6 = vector.broadcast %5 : vector<1x8xf32> to vector<16x8xf32>
    %7 = arith.mulf %4, %6 : vector<16x8xf32>
    %cst = arith.constant dense<0.000000e+00> : vector<16xf32>
    %8 = vector.multi_reduction <add>, %7, %cst [1] : vector<16x8xf32> to vector<16xf32>
    %9 = vector.shape_cast %8 : vector<16xf32> to vector<16x1xf32>
    %c0_4 = arith.constant 0 : index
    %c0_5 = arith.constant 0 : index
    %10 = vector.load %arg3[%c0_4, %c0_5] : memref<1x16xf32, #tpu.memory_space<vmem>>, vector<1x16xf32>
    %11 = vector.broadcast %9 : vector<16x1xf32> to vector<16x16xf32>
    %12 = vector.broadcast %10 : vector<1x16xf32> to vector<16x16xf32>
    %13 = arith.addf %11, %12 : vector<16x16xf32>
    %cst_6 = arith.constant 0.000000e+00 : f32
    %14 = vector.broadcast %cst_6 : f32 to vector<16x16xf32>
    %15 = arith.cmpf ogt, %13, %14 : vector<16x16xf32>
    %cst_7 = arith.constant 2.000000e-01 : f32
    %16 = vector.broadcast %cst_7 : f32 to vector<16x16xf32>
    %17 = arith.mulf %16, %13 : vector<16x16xf32>
    %18 = arith.select %15, %13, %17 : vector<16x16xi1>, vector<16x16xf32>
    %19 = tpu.iota {dimensions = array<i32: 1>} : vector<16x16xi32>
    %20 = tpu.iota {dimensions = array<i32: 0>} : vector<16x16xi32>
    %21 = vector.broadcast %1 : i32 to vector<16x16xi32>
    %22 = arith.addi %20, %21 : vector<16x16xi32>
    %c0_8 = arith.constant 0 : index
    %c0_9 = arith.constant 0 : index
    %23 = vector.load %arg1[%c0_8, %c0_9] : memref<16x16xbf16, #tpu.memory_space<vmem>>, vector<16x16xbf16>
    %cst_10 = arith.constant 0.000000e+00 : bf16
    %24 = vector.broadcast %cst_10 : bf16 to vector<16x16xbf16>
    %25 = arith.cmpf ogt, %23, %24 : vector<16x16xbf16>
    %26 = arith.cmpi eq, %19, %22 : vector<16x16xi32>
    %27 = arith.ori %25, %26 : vector<16x16xi1>
    %cst_11 = arith.constant -1.000000e+30 : f32
    %28 = vector.broadcast %cst_11 : f32 to vector<16x16xf32>
    %29 = arith.select %27, %18, %28 : vector<16x16xi1>, vector<16x16xf32>
    %cst_12 = arith.constant dense<0xFF800000> : vector<16xf32>
    %30 = vector.multi_reduction <maximumf>, %29, %cst_12 [1] : vector<16x16xf32> to vector<16xf32>
    %31 = vector.shape_cast %30 : vector<16xf32> to vector<16x1xf32>
    %32 = vector.broadcast %31 : vector<16x1xf32> to vector<16x16xf32>
    %33 = arith.subf %29, %32 : vector<16x16xf32>
    %34 = math.exp %33 : vector<16x16xf32>
    %cst_13 = arith.constant dense<0.000000e+00> : vector<16xf32>
    %35 = vector.multi_reduction <add>, %34, %cst_13 [1] : vector<16x16xf32> to vector<16xf32>
    %36 = vector.shape_cast %35 : vector<16xf32> to vector<16x1xf32>
    %37 = tpu.reciprocal %36 {approx = true} : vector<16x1xf32> -> vector<16x1xf32>
    %38 = vector.broadcast %37 : vector<16x1xf32> to vector<16x16xf32>
    %39 = arith.mulf %34, %38 : vector<16x16xf32>
    %40 = arith.truncf %39 : vector<16x16xf32> to vector<16x16xbf16>
    %41 = arith.truncf %2 : vector<16x8xf32> to vector<16x8xbf16>
    %cst_14 = arith.constant dense<0.000000e+00> : vector<16x8xf32>
    %42 = tpu.matmul %40, %41, %cst_14 {dimension_numbers = #tpu.dot_dimension_numbers<[1], [0], [0], [1], [0, 0, 1, 1], [], []>} : vector<16x16xbf16>, vector<16x8xbf16>, vector<16x8xf32> -> vector<16x8xf32>
    %c1 = arith.constant 1 : index
    %c0_15 = arith.constant 0 : index
    %43 = vector.load %arg4[%c1, %c0_15] : memref<4x8xf32, #tpu.memory_space<vmem>>, vector<1x8xf32>
    %44 = vector.broadcast %43 : vector<1x8xf32> to vector<16x8xf32>
    %45 = arith.addf %42, %44 : vector<16x8xf32>
    %cst_16 = arith.constant 0.000000e+00 : f32
    %46 = vector.broadcast %cst_16 : f32 to vector<16x8xf32>
    %47 = arith.maximumf %45, %46 : vector<16x8xf32>
    %c2 = arith.constant 2 : index
    %c0_17 = arith.constant 0 : index
    %48 = vector.load %arg4[%c2, %c0_17] : memref<4x8xf32, #tpu.memory_space<vmem>>, vector<1x8xf32>
    %cst_18 = arith.constant dense<0.000000e+00> : vector<1x16xf32>
    %49 = tpu.matmul %48, %47, %cst_18 {dimension_numbers = #tpu.dot_dimension_numbers<[1], [1], [0], [0], [0, 0, 1, 0], [], []>} : vector<1x8xf32>, vector<16x8xf32>, vector<1x16xf32> -> vector<1x16xf32>
    %c3 = arith.constant 3 : index
    %c0_19 = arith.constant 0 : index
    %50 = vector.load %arg4[%c3, %c0_19] : memref<4x8xf32, #tpu.memory_space<vmem>>, vector<1x1xf32>
    %51 = vector.broadcast %50 : vector<1x1xf32> to vector<1x16xf32>
    %52 = arith.addf %49, %51 : vector<1x16xf32>
    %53 = arith.negf %52 : vector<1x16xf32>
    %54 = math.exp %53 : vector<1x16xf32>
    %cst_20 = arith.constant 1.000000e+00 : f32
    %55 = vector.broadcast %cst_20 : f32 to vector<1x16xf32>
    %56 = arith.addf %55, %54 : vector<1x16xf32>
    %57 = arith.divf %55, %56 : vector<1x16xf32>
    %c0_21 = arith.constant 0 : index
    %c0_22 = arith.constant 0 : index
    %58 = vector.load %arg5[%c0_21, %c0_22] : memref<1x16xf32, #tpu.memory_space<vmem>>, vector<1x16xf32>
    tpu.vector_store %arg5[%c0_21, %c0_22], %57 {strides = array<i32>} : memref<1x16xf32, #tpu.memory_space<vmem>>, vector<1x16xf32>,
    return
  }
  func.func @transform_0(%arg0: i32) -> (i32, i32) {
    %c0_i32 = arith.constant 0 : i32
    %c0_i32_0 = arith.constant 0 : i32
    return %arg0, %c0_i32 : i32, i32
  }
  func.func @transform_1(%arg0: i32) -> (i32, i32) {
    %c0_i32 = arith.constant 0 : i32
    %c0_i32_0 = arith.constant 0 : i32
    %c0_i32_1 = arith.constant 0 : i32
    return %c0_i32, %c0_i32_0 : i32, i32
  }
  func.func @transform_2(%arg0: i32) -> (i32, i32) {
    %c0_i32 = arith.constant 0 : i32
    %c0_i32_0 = arith.constant 0 : i32
    %c0_i32_1 = arith.constant 0 : i32
    return %c0_i32, %c0_i32_0 : i32, i32
  }
  func.func @transform_3(%arg0: i32) -> (i32, i32) {
    %c0_i32 = arith.constant 0 : i32
    %c0_i32_0 = arith.constant 0 : i32
    %c0_i32_1 = arith.constant 0 : i32
    return %c0_i32, %c0_i32_0 : i32, i32
  }
  func.func @transform_4(%arg0: i32) -> (i32, i32) {
    %c0_i32 = arith.constant 0 : i32
    %c0_i32_0 = arith.constant 0 : i32
    return %c0_i32, %arg0 : i32, i32
  }
}

</mosaic_0001>

<bundles_post_ra>
// kernel: _lambda_.3
= control target key start
LH: loop header
LB: loop body
LE: loop exit
PB: predicated region body
PF: predicated region fallthrough
CT: control target
= control target key end

     0   :  { %vm20_vm0 = vcmask 261120   ;;  %vm106_vm1 = vcmask 130048   ;;  %s318_s1 = inlined_call_operand.vmem [shape: f32[32,16], index: 1, kind: input, shape index: {}]   ;;  %s319_s0 = inlined_call_operand.vmem [shape: f32[16,32], index: 0, kind: input, shape index: {}]   ;;  %s320_s2 = inlined_call_operand.vmem [shape: f32[16,32], index: 2, kind: input, shape index: {}]   ;;  %s321_s3 = inlined_call_operand.vmem [shape: f32[16,32], index: 3, kind: output, shape index: {}]  }
   0x1   :  { %v16_v0 = vld [vmem:[%s318_s1] sm:$0xff]  ;;  %v17_v1 = vld [vmem:[%s318_s1 + $0x8] sm:$0xff]  ;;  %v18_v2 = vld [vmem:[%s318_s1 + $0x10] sm:$0xff] }
   0x2   :  { %v244_v3 = vpack.c.bf16 %v17_v1, %v16_v0  ;;  %v19_v4 = vld [vmem:[%s318_s1 + $0x18] sm:$0xff]  ;;  %v14_v5 = vld [vmem:[%s319_s0] sm:$0xff]  ;;  %v15_v7 = vld [vmem:[%s319_s0 + $0x8] sm:$0xff] }
   0x3   :  { %v248_v6 = vpack.c.bf16 %v19_v4, %v18_v2  ;;  %234 = vmatprep.mubr.msk.f32.mxu0 %vm20_vm0, %v14_v5  ;;  %v104_v8 = vld [vmem:[%s320_s2] sm:$0xff]  ;;  %v105_v9 = vld [vmem:[%s320_s2 + $0x8] sm:$0xff] }
   0x4   :  { %245 = vmatprep.subr.bf16.mxu0 %v244_v3  ;;  %v252_v10 = vpack.c.bf16 %v105_v9, %v104_v8 }
   0x5   :  { %247 = vmatpush3.bf16.msra.mxu0 %v244_v3 }
   0x6   :  { %249 = vmatprep.subr.bf16.mxu0 %v248_v6  ;;  %253 = vmatprep.subr.bf16.mxu1 %v252_v10 }
   0x7   :  { %255 = vmatpush3.bf16.msra.mxu1 %v252_v10 }
   0x9   :  { %251 = vmatpush3.bf16.msra.mxu0 %v248_v6 }
   0xc   :  { %235 = vmatmul.mubr.msk.f32.vlgmr.msra.gmra.mrb[0].mxu0 %vm20_vm0, %v15_v7 }
  0xdf   :  { %v236_v11 = vpop.f32.mrb[0].mxu0 }
  0xe0   :  { %v93_v12 = vpop.f32.mrb[1].mxu0  ;;  %v103_v14 = vmax.f32 %v236_v11, 0.0 }
  0xe1   :  { %v102_v13 = vmax.f32 %v93_v12, 0.0 }
  0xe3   :  { %241 = vmatprep.mubr.msk.f32.mxu1 %vm106_vm1, %v102_v13 }
  0xe4   :  { %242 = vmatmul.mubr.msk.f32.vlgmr.msra.gmra.mrb[0].mxu1 %vm106_vm1, %v103_v14 }
 0x1b7   :  { %v243_v15 = vpop.f32.mrb[0].mxu1 }
 0x1b8   :  { %v215_v16 = vmul.f32 -2.0, %v243_v15  ;;  %v179_v17 = vpop.f32.mrb[1].mxu1 }
 0x1b9   :  { %v214_v18 = vmul.f32 -2.0, %v179_v17 }
 0x1ba   :  { %v194_v19 = vmul.f32 1.442695, %v215_v16 }
 0x1bb   :  { %v192_v20 = vmul.f32 1.442695, %v214_v18 }
 0x1bc   :  { %256 = vpow2.f32 %v194_v19 }
 0x1bd   :  { %258 = vpow2.f32 %v192_v20 }
 0x1c6   :  { %v257_v21 = vpop.eup %256 }
 0x1c7   :  { %v259_v22 = vpop.eup %258  ;;  %v197_v23 = vadd.f32 1.0, %v257_v21 }
 0x1c8   :  { %v196_v24 = vadd.f32 1.0, %v259_v22 }
 0x1c9   :  { %260 = vrcp.f32 %v197_v23 }
 0x1ca   :  { %262 = vrcp.f32 %v196_v24 }
 0x1d3   :  { %v261_v25 = vpop.eup %260 }
 0x1d4   :  { %v263_v26 = vpop.eup %262  ;;  %v203_v27 = vmul.f32 %v261_v25, %v15_v7 }
 0x1d5   :  { %v202_v28 = vmul.f32 %v263_v26, %v14_v5 }
 0x1d6   :  { %205 = vst.msk [vmem:[%s321_s3 + $0x8] sm:$0xff] %vm20_vm0, %v203_v27 }
 0x1d7   :  { %204 = vst.msk [vmem:[%s321_s3] sm:$0xff] %vm20_vm0, %v202_v28 }

// kernel: _lambda_.4
= control target key start
LH: loop header
LB: loop body
LE: loop exit
PB: predicated region body
PF: predicated region fallthrough
CT: control target
= control target key end

     0   :  { %v561_v0 = vmov 0.0   ;;  %vm562_vm0 = vmmov 0   ;;  %v563_v4 = vmov 0   ;;  %vm36_vm1 = vcmask 130048   ;;  %s672_s2 = inlined_call_operand.vmem [shape: f32[16,32], index: 2, kind: input, shape index: {}]   ;;  %s673_s0 = inlined_call_operand.vmem [shape: bf16[16,16], index: 0, kind: input, shape index: {}]   ;;  %s674_s1 = inlined_call_operand.vmem [shape: f32[16,1], index: 1, kind: input, shape index: {}]   ;;  %s675_s3 = inlined_call_operand.vmem [shape: f32[65,16], index: 3, kind: input, shape index: {}]   ;;  %s676_s4 = inlined_call_operand.vmem [shape: f32[17,8], index: 4, kind: input, shape index: {}]   ;;  %s677_s5 = inlined_call_operand.vmem [shape: f32[16,8], index: 5, kind: output, shape index: {0}]   ;;  %s678_s6 = inlined_call_operand.vmem [shape: f32[1,16], index: 6, kind: output, shape index: {1}]  }
   0x1   :  { %485 = vmatprep.subr.bf16.mxu0 %v561_v0  ;;  %v24_v1 = vld [vmem:[%s672_s2] sm:$0xff]  ;;  %v25_v2 = vld [vmem:[%s672_s2 + $0x8] sm:$0xff]  ;;  %487 = vmatprep.mubr.msk.bf16.mxu0 %vm562_vm0, %v561_v0  ;;  %v98_v11 = vld [vmem:[%s675_s3 + $0x10] sm:$0xff]  ;;  %vm109_vm2 = vcmask 261120   ;;  %v564_v38 = vmov 0.0|0.0   ;;  %vm359_vm3 = vcmask 64512  }
   0x2   :  { %v30_v3 = vpack.c.bf16 %v25_v2, %v24_v1  ;;  %559 = vset.pattern.permute.xlu0 %v563_v4  ;;  %v26_v5 = vld [vmem:[%s674_s1] sm:$0xff]  ;;  %v97_v8 = vld [vmem:[%s675_s3 + $0x8] sm:$0xff]  ;;  %v99_v12 = vld [vmem:[%s675_s3 + $0x18] sm:$0xff]  ;;  %vm442_vm5 = vcmask 122880  }
   0x3   :  { %v560_v6 = vld [vmem:[%s673_s0] sm:$0xff]   ;;  %83 = vperm.xlu0 %559, %v26_v5   ;;  %v27_v9 = vld [vmem:[%s674_s1 + $0x8] sm:$0xff]  ;;  %v531_v13 = vpack.c.bf16 %v99_v12, %v98_v11  ;;  %v102_v22 = vld [vmem:[%s675_s3 + $0x30] sm:$0xff] }
   0x4   :  { %v96_v7 = vld [vmem:[%s675_s3] sm:$0xff]  ;;  %486 = vmatpush3.bf16.msra.mxu0 %v30_v3  ;;  %v101_v15 = vld [vmem:[%s675_s3 + $0x28] sm:$0xff]  ;;  %v103_v23 = vld [vmem:[%s675_s3 + $0x38] sm:$0xff] }
   0x5   :  { %v527_v10 = vpack.c.bf16 %v97_v8, %v96_v7  ;;  %v100_v14 = vld [vmem:[%s675_s3 + $0x20] sm:$0xff]  ;;  %v277_v18 = vld [vmem:[%s676_s4 + $0x8] sm:$0xff]  ;;  %v539_v30 = vpack.c.bf16 %v103_v23, %v102_v22  ;;  %vm549_vm4 = vmpackc.low %vm359_vm3, %vm359_vm3 }
   0x6   :  { %v535_v16 = vpack.c.bf16 %v101_v15, %v100_v14  ;;  %v276_v17 = vld [vmem:[%s676_s4] sm:$0xff]  ;;  %v362_v42 = vld [vmem:[%s676_s4 + $0x10] sm:$0x1] }
   0x7   :  { %528 = vmatprep.subr.bf16.mxu1 %v527_v10  ;;  %488 = vmatmul.mubr.msk.bf16.vlgmr.msra.gmra.mrb[0].mxu0 %vm36_vm1, %v560_v6  ;;  %v543_v19 = vpack.c.bf16 %v277_v18, %v276_v17  ;;  %v454_v31 = vld [vmem:[%s675_s3 + $0x40] ss:$0 sm:$0xff] }
   0x8   :  { %88 = vperm.xlu0 %559, %v27_v9   ;;  %530 = vmatpush3.bf16.msra.mxu1 %v527_v10 }
   0x9   :  { %532 = vmatprep.subr.bf16.mxu1 %v531_v13  ;;  %544 = vmatprep.subr.bf16.mxu0 %v543_v19 }
   0xa   :  { %546 = vmatpush3.bf16.msra.mxu0 %v543_v19 }
   0xb   :  { %547 = vmatprep.subr.bf16.mxu0 %v564_v38 }
   0xc   :  { %534 = vmatpush3.bf16.msra.mxu1 %v531_v13 }
   0xd   :  { %536 = vmatprep.subr.bf16.mxu1 %v535_v16 }
  0x82   :  { %v84_v20 = vpop.permute.xlu0 %83 }
  0x87   :  { %v89_v26 = vpop.permute.xlu0 %88 }
  0xda   :  { %v74_v21 = vpop.f32.mrb[0].mxu0 }
  0xdb   :  { %v91_v24 = vmul.f32 %v84_v20, %v74_v21  ;;  %v489_v25 = vpop.f32.mrb[1].mxu0 }
  0xdc   :  { %v77_v27 = vpop.f32.mrb[2].mxu0 }
  0xdd   :  { %v92_v28 = vmul.f32 %v89_v26, %v77_v27  ;;  %v490_v29 = vpop.f32.mrb[3].mxu0  ;;  %499 = vmatprep.mubr.msk.f32.mxu1 %vm109_vm2, %v91_v24 }
  0xdf   :  { %500 = vmatmul.mubr.msk.f32.vlgmr.msra.gmra.mrb[0].mxu1 %vm109_vm2, %v92_v28 }
  0xe0   :  { %538 = vmatpush3.bf16.msra.mxu1 %v535_v16  ;;  %510 = vmatprep.mubr.msk.f32.mxu1 %vm109_vm2, %v24_v1 }
  0xe1   :  { %540 = vmatprep.subr.bf16.mxu1 %v539_v30 }
  0xe4   :  { %542 = vmatpush3.bf16.msra.mxu1 %v539_v30 }
  0xe7   :  { %511 = vmatmul.mubr.msk.f32.vlgmr.msra.gmra.mrb[0].mxu1 %vm109_vm2, %v25_v2 }
 0x1ba   :  { %v512_v32 = vpop.f32.mrb[0].mxu1 }
 0x1bb   :  { %v551_v33 = vadd.f32 %v512_v32, %v454_v31  ;;  %v263_v34 = vpop.f32.mrb[1].mxu1 }
 0x1bc   :  { %v552_v35 = vadd.f32 %v454_v31, %v263_v34 }
 0x1bd   :  { %v275_v37 = vmax.f32 %v551_v33, 0.0 }
 0x1be   :  { %v274_v36 = vmax.f32 %v552_v35, 0.0 }
 0x1c0   :  { %517 = vmatprep.mubr.msk.f32.mxu0 %vm36_vm1, %v274_v36 }
 0x1c1   :  { %518 = vmatmul.mubr.msk.f32.vlgmr.msra.gmra.mrb[4].mxu0 %vm36_vm1, %v275_v37 }
 0x1c2   :  { %524 = vmatprep.mubr.msk.f32.mxu0 %vm562_vm0, %v561_v0 }
 0x294   :  { %v519_v39 = vpop.f32.mrb[4].mxu0 }
 0x295   :  { %361 = vst.msk [vmem:[%s677_s5 + $0x8] sm:$0xff] %vm359_vm3, %v519_v39  ;;  %v350_v40 = vpop.f32.mrb[5].mxu0 }
 0x296   :  { %360 = vst.msk [vmem:[%s677_s5] sm:$0xff] %vm359_vm3, %v350_v40  ;;  %v548_v41 = vpack.c.bf16 %v519_v39, %v350_v40 }
 0x298   :  { %550 = vmatpush3.bf16.xpose.msk.msra.mxu0 %vm549_vm4, %v548_v41 }
 0x29f   :  { %525 = vmatmul.mubr.msk.f32.vlgmr.msra.gmra.mrb[6].mxu0 %vm359_vm3, %v362_v42 }
 0x372   :  { %v438_v43 = vpop.f32.mrb[6].mxu0 }
 0x373   :  { %443 = vst.msk [vmem:[%s678_s6] sm:$0x1] %vm442_vm5, %v438_v43  ;;  %v526_v44 = vpop.f32.mrb[7].mxu0 }

// kernel: _lambda_.5
= control target key start
LH: loop header
LB: loop body
LE: loop exit
PB: predicated region body
PF: predicated region fallthrough
CT: control target
= control target key end

     0   :  { %vm34_vm0 = vcmask 64512   ;;  %s425_s0 = inlined_call_operand.vmem [shape: bf16[16,16], index: 0, kind: input, shape index: {}]   ;;  %s426_s1 = inlined_call_operand.vmem [shape: f32[16,8], index: 1, kind: input, shape index: {}]   ;;  %s427_s2 = inlined_call_operand.vmem [shape: f32[1,16], index: 2, kind: input, shape index: {}]   ;;  %s428_s3 = inlined_call_operand.vmem [shape: f32[4,8], index: 3, kind: input, shape index: {}]   ;;  %s429_s4 = inlined_call_operand.hbm [shape: f32[1,16], index: 4, kind: output, shape index: {}]  }
   0x1   :  { %v371_v0 = vld [vmem:[%s426_s1] sm:$0xff]  ;;  %v379_v2 = vld [vmem:[%s426_s1 + $0x8] sm:$0xff] }
   0x2   :  { %v266_v1 = vld [vmem:[%s428_s3] ss:$0 sm:$0xff] }
   0x3   :  { %v32_v3 = vmul.f32 %v266_v1, %v371_v0  ;;  %v33_v4 = vmul.f32 %v266_v1, %v379_v2 }
   0x4   :  { %9 = vsyncpa [#allocation3], 0  ;;  %v338_v7 = vmov 0   ;;  %v56_v8 = vlaneseq  ;;  %v64_v11 = vld [vmem:[%s425_s0] sm:$0xf]  ;;  %vm82_vm11 = vcmask 130048   ;;  %v106_v41 = vpack.c.bf16 %v379_v2, %v371_v0 }
   0x5   :  { %v35_v5 = vsel %vm34_vm0, %v32_v3, 0.0  ;;  %v38_v6 = vsel %vm34_vm0, %v33_v4, 0.0  ;;  %301 = vset.pattern.permute.xlu0 %v338_v7  ;;  %vm66_vm2 = vcmp.gt.bf16.partialorder %v64_v11, 0  ;;  %v65_v13 = vld [vmem:[%s425_s0 + $0x4] sm:$0xf]  ;;  %v339_v42 = vmov 0.0   ;;  %vm294_vm15 = vmpackc.low %vm34_vm0, %vm34_vm0 }
   0x6   :  { %36 = vadd.xlane.f32.xlu0 %v35_v5  ;;  %v57_v9 = vand.u32 127, %v56_v8  ;;  %v59_v10 = vshrl.u32 %v56_v8, 7  ;;  %vm67_vm6 = vcmp.gt.bf16.partialorder %v65_v13, 0  ;;  %v267_v15 = vld [vmem:[%s427_s2] ss:$0 sm:$0xff]  ;;  %279 = vmatprep.subr.bf16.mxu0 %v339_v42  ;;  %vm340_vm14 = vmmov 0  }
   0x7   :  { %281 = vmatprep.mubr.msk.bf16.mxu0 %vm340_vm14, %v339_v42  ;;  %280 = vmatpush3.bf16.msra.mxu0 %v106_v41  ;;  %v341_v50 = vmov 0.0|0.0   ;;  %v159_v51 = vld [vmem:[%s428_s3 + $0x3] sm:$0x1]  ;;  %v268_v52 = vld [vmem:[%s428_s3 + $0x1] ss:$0 sm:$0xff]  ;;  %s342_s30 = smov [#allocation2]  }
   0x8   :  { %vm68_vm1 = vcmp.eq.s32.totalorder %v57_v9, %v59_v10  ;;  %v60_v12 = vadd.s32 8, %v59_v10  ;;  %289 = vmatprep.mubr.msk.f32.mxu1 %vm340_vm14, %v339_v42  ;;  %292 = vmatprep.subr.bf16.mxu1 %v341_v50  ;;  %v158_v62 = vld [vmem:[%s428_s3 + $0x2] sm:$0x1]  ;;  %s258_s5 = sshll.u32 %s342_s30, 4  ;;  %s259_s5 = int_to_ptr.vmem [resolvable:$true] %s258_s5 }
   0x9   :  { %vm70_vm3 = vmpackc.low %vm68_vm1, %vm68_vm1  ;;  %vm250_vm1 = vcmask 122880   ;;  %s314_s6 = scalar_lea.vmem %s259_s5, 16  ;;  %s318_s3 = scalar_lea.vmem %s259_s5, 32 }
   0xa   :  { %39 = vadd.xlane.f32.xlu0 %v38_v6  ;;  %vm69_vm4 = vcmp.eq.s32.totalorder %v57_v9, %v60_v12  ;;  %vm72_vm5 = vmor %vm66_vm2, %vm70_vm3  ;;  %p315_p0 = scmp.ne.s32.totalorder %s259_s5, %s314_s6  ;;  %p319_p1 = scmp.lt.s32.totalorder %s259_s5, %s259_s5 }
   0xb   :  { %vm71_vm7 = vmpackc.low %vm69_vm4, %vm69_vm4  ;;  %v74_v14 = vsel %vm72_vm5, 65537, %v338_v7  ;;  %p320_p2 = scmp.lt.s32.totalorder %s318_s3, %s314_s6 }
   0xc   :  { %vm73_vm8 = vmor %vm67_vm6, %vm71_vm7  ;;  %v76_v16 = vunpack.c.l.b16 %v74_v14 }
   0xd   :  { %v75_v18 = vsel %vm73_vm8, 65537, %v338_v7  ;;  %p321_p3 = por %p320_p2, %p319_p1 }
   0xe   :  { %vm78_vm10 = vcmp.ne.s32.totalorder %v76_v16, 0  ;;  %v77_v21 = vunpack.c.l.b16 %v75_v18 }
   0xf   :  { %p322_p4 = pnand %p321_p3, %p315_p0 }
  0x10   :  { %vm79_vm13 = vcmp.ne.s32.totalorder %v77_v21, 0 }
  0x93   :  { %v37_v17 = vpop.xlane.xlu0 %36 }
  0x94   :  { %v48_v19 = vadd.f32 %v267_v15, %v37_v17 }
  0x96   :  { %v52_v20 = vmul.f32 0.2, %v48_v19  ;;  %vm50_vm9 = vcmp.gt.f32.partialorder %v48_v19, 0.0 }
  0x97   :  { %v40_v22 = vpop.xlane.xlu0 %39 }
  0x98   :  { %v49_v23 = vadd.f32 %v267_v15, %v40_v22  ;;  %v54_v24 = vsel %vm50_vm9, %v48_v19, %v52_v20 }
  0x99   :  { %v80_v25 = vsel %vm78_vm10, %v54_v24, -1e+30 }
  0x9a   :  { %v53_v26 = vmul.f32 0.2, %v49_v23  ;;  %v83_v27 = vsel %vm82_vm11, %v80_v25, -inf  ;;  %vm51_vm12 = vcmp.gt.f32.partialorder %v49_v23, 0.0 }
  0x9b   :  { %84 = vmax.xlane.f32.xlu1 %v83_v27 }
  0x9c   :  { %v55_v28 = vsel %vm51_vm12, %v49_v23, %v53_v26 }
  0x9d   :  { %v81_v29 = vsel %vm79_vm13, %v55_v28, -1e+30 }
  0x9e   :  { %v86_v30 = vsel %vm82_vm11, %v81_v29, -inf }
  0x9f   :  { %87 = vmax.xlane.f32.xlu1 %v86_v30 }
 0x128   :  { %v85_v31 = vpop.xlane.xlu1 %84 }
 0x129   :  { %v89_v32 = vsub.f32 %v80_v25, %v85_v31 }
 0x12b   :  { %v91_v33 = vmul.f32 1.442695, %v89_v32 }
 0x12c   :  { %v88_v34 = vpop.xlane.xlu1 %87 }
 0x12d   :  { %302 = vpow2.f32 %v91_v33  ;;  %v90_v35 = vsub.f32 %v81_v29, %v88_v34 }
 0x12f   :  { %v93_v36 = vmul.f32 1.442695, %v90_v35 }
 0x131   :  { %304 = vpow2.f32 %v93_v36 }
 0x137   :  { %v303_v37 = vpop.eup %302 }
 0x138   :  { %v95_v38 = vsel %vm82_vm11, %v303_v37, 0.0 }
 0x139   :  { %96 = vadd.xlane.f32.xlu0 %v95_v38 }
 0x13b   :  { %v305_v39 = vpop.eup %304 }
 0x13c   :  { %v98_v40 = vsel %vm82_vm11, %v305_v39, 0.0 }
 0x13d   :  { %99 = vadd.xlane.f32.xlu1 %v98_v40 }
 0x14f   :  { %162 = vperm.xlu0 %301, %v159_v51  }
 0x1c6   :  { %v97_v43 = vpop.xlane.xlu0 %96 }
 0x1c7   :  { %306 = vrcp.f32 %v97_v43 }
 0x1ca   :  { %v100_v44 = vpop.xlane.xlu1 %99 }
 0x1cb   :  { %308 = vrcp.f32 %v100_v44 }
 0x1ce   :  { %v163_v63 = vpop.permute.xlu0 %162 }
 0x1d1   :  { %v307_v45 = vpop.eup %306 }
 0x1d2   :  { %v103_v47 = vmul.f32 %v307_v45, %v303_v37 }
 0x1d5   :  { %v309_v46 = vpop.eup %308 }
 0x1d6   :  { %v104_v48 = vmul.f32 %v309_v46, %v305_v39 }
 0x1d8   :  { %v105_v49 = vpack.c.bf16 %v104_v48, %v103_v47 }
 0x1da   :  { %282 = vmatmul.mubr.msk.bf16.vlgmr.msra.gmra.mrb[0].mxu0 %vm82_vm11, %v105_v49 }
 0x2ad   :  { %v149_v53 = vpop.f32.mrb[0].mxu0 }
 0x2ae   :  { %v150_v54 = vadd.f32 %v268_v52, %v149_v53  ;;  %v283_v55 = vpop.f32.mrb[1].mxu0 }
 0x2af   :  { %v152_v56 = vpop.f32.mrb[2].mxu0 }
 0x2b0   :  { %v153_v57 = vadd.f32 %v268_v52, %v152_v56  ;;  %v284_v58 = vpop.f32.mrb[3].mxu0  ;;  %v156_v59 = vmax.f32 %v150_v54, 0.0 }
 0x2b2   :  { %v157_v60 = vmax.f32 %v153_v57, 0.0 }
 0x2b4   :  { %v293_v61 = vpack.c.bf16 %v157_v60, %v156_v59 }
 0x2b6   :  { %295 = vmatpush3.bf16.xpose.msk.msra.mxu1 %vm294_vm15, %v293_v61 }
 0x2bd   :  { %290 = vmatmul.mubr.msk.f32.vlgmr.msra.gmra.mrb[0].mxu1 %vm34_vm0, %v158_v62 }
 0x390   :  { %v240_v0 = vpop.f32.mrb[0].mxu1 }
 0x391   :  { %v241_v1 = vadd.f32 %v240_v0, %v163_v63  ;;  %v291_v2 = vpop.f32.mrb[1].mxu1 }
 0x393   :  { %v273_v3 = vmul.f32 -1.442695, %v241_v1 }
 0x395   :  { %310 = vpow2.f32 %v273_v3 }
 0x39f   :  { %v311_v4 = vpop.eup %310 }
 0x3a0   :  { %v247_v5 = vadd.f32 1.0, %v311_v4 }
 0x3a2   :  { %312 = vrcp.f32 %v247_v5 }
 0x3ac   :  { %v313_v6 = vpop.eup %312 }
 0x3ad   :  { %251 = vst.msk [vmem:[#allocation2] sm:$0x1] %vm250_vm1, %v313_v6 }
 0x3ae   :  { %325 = shalt.err (!%p322_p4)
}
 0x3af   :  { %s326_s9 = scalar_lea.hbm %s429_s4, 16 }
 0x3b0   :  { %p327_p5 = scmp.ne.s32.totalorder %s429_s4, %s326_s9  ;;  %p330_p6 = scmp.lt.u32.totalorder %s326_s9, %s429_s4 }
 0x3b2   :  { %p332_p7 = pnand %p330_p6, %p327_p5 }
 0x3b4   :  { %335 = shalt.err (!%p332_p7)
}
 0x3b5   :  { %261 = dma.vmem_to_hbm [thread:$0]  %s259_s5, 16, %s429_s4, [#allocation3]  }
 0x3b6   :  { %336 = dma.done.wait [#allocation3], 16  }
 0x3b7   :  { %337 = vsyncadd [#allocation3], 4294967280 }
 0x3b8   :  { %265 = vsyncpa [#allocation3], 1 }

</bundles_post_ra>
